<compile_context>
chip_gen: v5e
topology: v5e:2x2
jax: 0.10.0
libtpu: 0.0.40
codegen_flags: <defaults>
</compile_context>

<pallas_src>
import functools
import math

import jax
import jax.numpy as jnp
from jax.experimental import pallas as pl
from jax.experimental.pallas import tpu as pltpu


OUT_W = 128     # lane-dense output width (unmasked writeback block)
L2_PAD = 128    # layer_size_2 = 100 -> padded to 128
L3_PAD = 64     # layer_size_3 = 50  -> padded to 64


def _round_up(n, m):
    return ((n + m - 1) // m) * m


# ---------------------------------------------------------------------------
# Pallas kernel: MLP trunk + single fused head matmul + NAF Q / sampling math.
# ---------------------------------------------------------------------------
def _naf_kernel(x_ref, noise_ref, act_ref,
                w1_ref, b1_ref, w2_ref, b2_ref, w3_ref, b3_ref,
                wh_ref, bh_ref,
                out_ref, *, action_size, n_tril):
    A = action_size
    f32 = jnp.float32
    bf16 = jnp.bfloat16

    x = x_ref[...]                                                      # (TB, S) bf16
    h = jnp.maximum(
        jnp.dot(x, w1_ref[...], preferred_element_type=f32) + b1_ref[...], 0.0)
    h = jnp.maximum(
        jnp.dot(h.astype(bf16), w2_ref[...], preferred_element_type=f32)
        + b2_ref[...], 0.0)
    h = jnp.maximum(
        jnp.dot(h.astype(bf16), w3_ref[...], preferred_element_type=f32)
        + b3_ref[...], 0.0)

    # One fused head matmul. Column layout of wh/bh (padded to 128 lanes):
    #   [0, A)                         action_values  (pre-tanh)
    #   [A, A+n_tril)                  matrix_entries (pre-tanh; off-diag dead)
    #   A+n_tril                       value head V
    #   [A+n_tril+1, A+n_tril+1+A)     duplicated diagonal-entry columns
    head = (jnp.dot(h.astype(bf16), wh_ref[...], preferred_element_type=f32)
            + bh_ref[...])                                              # (TB, 128)

    mu = jnp.tanh(head[:, :A])                                          # (TB, A)
    V = head[:, A + n_tril:A + n_tril + 1]                              # (TB, 1)
    d = jnp.tanh(head[:, A + n_tril + 1:A + n_tril + 1 + A])            # (TB, A)

    # P = L * L.transpose(2,1) is elementwise in the reference -> P is diagonal
    # with P_ii = exp(d_i)^2 (off-diagonal tril entries never affect outputs).
    p_diag = jnp.exp(2.0 * d)

    diff = act_ref[...] - mu
    q = -0.5 * jnp.sum(p_diag * diff * diff, axis=-1, keepdims=True) + V

    # MultivariateNormal(mu, P^-1).sample() == mu + eps * exp(-d) (P diagonal),
    # then clamp to [-1, 1].
    sample = jnp.clip(mu + noise_ref[...] * jnp.exp(-d), -1.0, 1.0)

    out_ref[...] = jnp.zeros_like(out_ref)
    out_ref[:, :A] = sample
    out_ref[:, A:A + 1] = q
    out_ref[:, A + 1:A + 2] = V


# ---------------------------------------------------------------------------
# pallas_call wrapper: batch-tiled grid, weights VMEM-resident across steps.
# ---------------------------------------------------------------------------
def naf_pallas(x, noise, action, kp, *, action_size):
    B, S = x.shape
    A = action_size
    n_tril = A * (A + 1) // 2

    TB = min(512, _round_up(B, 8))
    B_pad = _round_up(B, TB)

    def pad_b(a):
        if a.shape[0] == B_pad:
            return a
        z = jnp.zeros((B_pad - a.shape[0],) + a.shape[1:], a.dtype)
        return jnp.concatenate([a, z], axis=0)

    x_p = pad_b(x.astype(jnp.bfloat16))
    noise_p = pad_b(noise.astype(jnp.float32))
    act_p = pad_b(action.astype(jnp.float32))

    kernel = functools.partial(_naf_kernel, action_size=A, n_tril=n_tril)

    def batch_spec(shape):
        return pl.BlockSpec(shape, lambda i: (i, 0))

    def resident(arr):
        return pl.BlockSpec(arr.shape, lambda i: (0, 0))

    out = pl.pallas_call(
        kernel,
        out_shape=jax.ShapeDtypeStruct((B_pad, OUT_W), jnp.float32),
        grid_spec=pltpu.PrefetchScalarGridSpec(
            num_scalar_prefetch=0,
            grid=(B_pad // TB,),
            in_specs=[
                batch_spec((TB, S)),        # x
                batch_spec((TB, A)),        # noise
                batch_spec((TB, A)),        # action
                resident(kp["w1"]), resident(kp["b1"]),
                resident(kp["w2"]), resident(kp["b2"]),
                resident(kp["w3"]), resident(kp["b3"]),
                resident(kp["wh"]), resident(kp["bh"]),
            ],
            out_specs=pl.BlockSpec((TB, OUT_W), lambda i: (i, 0)),
        ),
        compiler_params=pltpu.CompilerParams(
            dimension_semantics=("parallel",)),
    )(x_p, noise_p, act_p,
      kp["w1"], kp["b1"], kp["w2"], kp["b2"], kp["w3"], kp["b3"],
      kp["wh"], kp["bh"])

    sampled = out[:B, :A]
    Q = out[:B, A:A + 1]
    V = out[:B, A + 1:A + 2]
    return sampled, Q, V


# ---------------------------------------------------------------------------
# Parameter construction (deterministic, PyTorch nn.Linear-style init) and
# host-side fusion / padding / bf16 cast of the kernel parameters.
# ---------------------------------------------------------------------------
def init_linear(key, fan_in, fan_out):
    kw, kb = jax.random.split(key)
    bound = 1.0 / math.sqrt(fan_in)
    w = jax.random.uniform(kw, (fan_in, fan_out), jnp.float32, -bound, bound)
    b = jax.random.uniform(kb, (1, fan_out), jnp.float32, -bound, bound)
    return w, b


def init_naf_params(key, state_size, action_size, layer_size):
    layer_size_2 = 100
    layer_size_3 = 50
    n_tril = action_size * (action_size + 1) // 2
    keys = jax.random.split(key, 6)
    p = {}
    p["w1"], p["b1"] = init_linear(keys[0], state_size, layer_size)
    p["w2"], p["b2"] = init_linear(keys[1], layer_size, layer_size_2)
    p["w3"], p["b3"] = init_linear(keys[2], layer_size_2, layer_size_3)
    p["wa"], p["ba"] = init_linear(keys[3], layer_size_3, action_size)
    p["wm"], p["bm"] = init_linear(keys[4], layer_size_3, n_tril)
    p["wv"], p["bv"] = init_linear(keys[5], layer_size_3, 1)
    return p


def prepare_kernel_params(p, *, action_size):
    A = action_size
    n_tril = A * (A + 1) // 2
    assert A + n_tril + 1 + A <= OUT_W, "fused head layout exceeds 128 lanes"
    layer_size = p["w1"].shape[1]
    L2 = p["w2"].shape[1]          # 100
    L3 = p["w3"].shape[1]          # 50
    # tril_indices are row-major, so the diagonal (k,k) sits at k*(k+1)/2 + k.
    diag_cols = jnp.asarray([k * (k + 1) // 2 + k for k in range(A)])

    w2 = jnp.zeros((layer_size, L2_PAD), jnp.float32).at[:, :L2].set(p["w2"])
    b2 = jnp.zeros((1, L2_PAD), jnp.float32).at[:, :L2].set(p["b2"])
    w3 = jnp.zeros((L2_PAD, L3_PAD), jnp.float32).at[:L2, :L3].set(p["w3"])
    b3 = jnp.zeros((1, L3_PAD), jnp.float32).at[:, :L3].set(p["b3"])

    wh = jnp.zeros((L3_PAD, OUT_W), jnp.float32)
    bh = jnp.zeros((1, OUT_W), jnp.float32)
    wh = wh.at[:L3, :A].set(p["wa"])
    bh = bh.at[:, :A].set(p["ba"])
    wh = wh.at[:L3, A:A + n_tril].set(p["wm"])
    bh = bh.at[:, A:A + n_tril].set(p["bm"])
    wh = wh.at[:L3, A + n_tril:A + n_tril + 1].set(p["wv"])
    bh = bh.at[:, A + n_tril:A + n_tril + 1].set(p["bv"])
    wh = wh.at[:L3, A + n_tril + 1:A + n_tril + 1 + A].set(p["wm"][:, diag_cols])
    bh = bh.at[:, A + n_tril + 1:A + n_tril + 1 + A].set(p["bm"][:, diag_cols])

    return {
        "w1": p["w1"].astype(jnp.bfloat16), "b1": p["b1"],
        "w2": w2.astype(jnp.bfloat16), "b2": b2,
        "w3": w3.astype(jnp.bfloat16), "b3": b3,
        "wh": wh.astype(jnp.bfloat16), "bh": bh,
    }


# ---------------------------------------------------------------------------
# Full NAF forward: everything numeric happens inside the Pallas kernel.
# ---------------------------------------------------------------------------
def naf_forward(kernel_params, input_, action=None, *, action_size, sample_key):
    B = input_.shape[0]
    A = action_size
    # TODO(synk): torch's RNG cannot be bit-matched; sampling semantics
    # (mean mu, covariance P^-1 which is diagonal, clamp to [-1,1]) are
    # reproduced with jax.random standard normals rescaled inside the kernel.
    noise = jax.random.normal(sample_key, (B, A), jnp.float32)
    act = action if action is not None else jnp.zeros((B, A), jnp.float32)
    sampled, Q, V = naf_pallas(input_, noise, act, kernel_params,
                               action_size=A)
    if action is None:
        Q = None
    return sampled, Q, V


# ---------------------------------------------------------------------------
if __name__ == "__main__":
    state_size = 16
    action_size = 4
    layer_size = 32
    batch = 8

    key = jax.random.PRNGKey(0)
    k_params, k_x, k_act, k_sample = jax.random.split(key, 4)

    raw_params = init_naf_params(k_params, state_size, action_size, layer_size)
    kparams = prepare_kernel_params(raw_params, action_size=action_size)

    x = jax.random.normal(k_x, (batch, state_size), jnp.float32)
    act = jnp.clip(jax.random.normal(k_act, (batch, action_size), jnp.float32),
                   -1.0, 1.0)

    sampled_action, Q, V = naf_forward(
        kparams, x, act, action_size=action_size, sample_key=k_sample)

    jax.block_until_ready((sampled_action, Q, V))
    assert sampled_action.shape == (batch, action_size)
    assert Q.shape == (batch, 1)
    assert V.shape == (batch, 1)
    assert bool(jnp.all(jnp.isfinite(sampled_action)))
    assert bool(jnp.all(jnp.isfinite(Q)))
    assert bool(jnp.all(jnp.isfinite(V)))
    print("KERNEL_OK")
</pallas_src>

<mosaic_0001>
module attributes {stable_mosaic.version = 11 : i64} {
  func.func @_naf_kernel(%arg0: i32, %arg1: memref<8x16xbf16, #tpu.memory_space<vmem>>, %arg2: memref<8x4xf32, #tpu.memory_space<vmem>>, %arg3: memref<8x4xf32, #tpu.memory_space<vmem>>, %arg4: memref<16x32xbf16, #tpu.memory_space<vmem>>, %arg5: memref<1x32xf32, #tpu.memory_space<vmem>>, %arg6: memref<32x128xbf16, #tpu.memory_space<vmem>>, %arg7: memref<1x128xf32, #tpu.memory_space<vmem>>, %arg8: memref<128x64xbf16, #tpu.memory_space<vmem>>, %arg9: memref<1x64xf32, #tpu.memory_space<vmem>>, %arg10: memref<64x128xbf16, #tpu.memory_space<vmem>>, %arg11: memref<1x128xf32, #tpu.memory_space<vmem>>, %arg12: memref<8x128xf32, #tpu.memory_space<vmem>>) attributes {dimension_semantics = [#tpu.dimension_semantics<parallel>], iteration_bounds = array<i64: 1>, scalar_prefetch = 0 : i64, scratch_operands = 0 : i64, tpu.core_type = #tpu.core_type<tc>, window_params = [{transform_indices = @transform_0, window_bounds = array<i64: 8, 16>}, {transform_indices = @transform_1, window_bounds = array<i64: 8, 4>}, {transform_indices = @transform_2, window_bounds = array<i64: 8, 4>}, {pipeline_mode = #tpu.pipeline_mode<synchronous>, transform_indices = @transform_3, window_bounds = array<i64: 16, 32>}, {pipeline_mode = #tpu.pipeline_mode<synchronous>, transform_indices = @transform_4, window_bounds = array<i64: 1, 32>}, {pipeline_mode = #tpu.pipeline_mode<synchronous>, transform_indices = @transform_5, window_bounds = array<i64: 32, 128>}, {pipeline_mode = #tpu.pipeline_mode<synchronous>, transform_indices = @transform_6, window_bounds = array<i64: 1, 128>}, {pipeline_mode = #tpu.pipeline_mode<synchronous>, transform_indices = @transform_7, window_bounds = array<i64: 128, 64>}, {pipeline_mode = #tpu.pipeline_mode<synchronous>, transform_indices = @transform_8, window_bounds = array<i64: 1, 64>}, {pipeline_mode = #tpu.pipeline_mode<synchronous>, transform_indices = @transform_9, window_bounds = array<i64: 64, 128>}, {pipeline_mode = #tpu.pipeline_mode<synchronous>, transform_indices = @transform_10, window_bounds = array<i64: 1, 128>}, {transform_indices = @transform_11, window_bounds = array<i64: 8, 128>}]} {
    %c0 = arith.constant 0 : index
    %c0_0 = arith.constant 0 : index
    %0 = vector.load %arg1[%c0, %c0_0] : memref<8x16xbf16, #tpu.memory_space<vmem>>, vector<8x16xbf16>
    %c0_1 = arith.constant 0 : index
    %c0_2 = arith.constant 0 : index
    %1 = vector.load %arg4[%c0_1, %c0_2] : memref<16x32xbf16, #tpu.memory_space<vmem>>, vector<16x32xbf16>
    %cst = arith.constant dense<0.000000e+00> : vector<8x32xf32>
    %2 = tpu.matmul %0, %1, %cst {dimension_numbers = #tpu.dot_dimension_numbers<[1], [0], [0], [1], [0, 0, 1, 1], [], []>} : vector<8x16xbf16>, vector<16x32xbf16>, vector<8x32xf32> -> vector<8x32xf32>
    %c0_3 = arith.constant 0 : index
    %c0_4 = arith.constant 0 : index
    %3 = vector.load %arg5[%c0_3, %c0_4] : memref<1x32xf32, #tpu.memory_space<vmem>>, vector<1x32xf32>
    %4 = vector.broadcast %3 : vector<1x32xf32> to vector<8x32xf32>
    %5 = arith.addf %2, %4 : vector<8x32xf32>
    %cst_5 = arith.constant 0.000000e+00 : f32
    %6 = vector.broadcast %cst_5 : f32 to vector<8x32xf32>
    %7 = arith.maximumf %5, %6 : vector<8x32xf32>
    %8 = arith.truncf %7 : vector<8x32xf32> to vector<8x32xbf16>
    %c0_6 = arith.constant 0 : index
    %c0_7 = arith.constant 0 : index
    %9 = vector.load %arg6[%c0_6, %c0_7] : memref<32x128xbf16, #tpu.memory_space<vmem>>, vector<32x128xbf16>
    %cst_8 = arith.constant dense<0.000000e+00> : vector<8x128xf32>
    %10 = tpu.matmul %8, %9, %cst_8 {dimension_numbers = #tpu.dot_dimension_numbers<[1], [0], [0], [1], [0, 0, 1, 1], [], []>} : vector<8x32xbf16>, vector<32x128xbf16>, vector<8x128xf32> -> vector<8x128xf32>
    %c0_9 = arith.constant 0 : index
    %c0_10 = arith.constant 0 : index
    %11 = vector.load %arg7[%c0_9, %c0_10] : memref<1x128xf32, #tpu.memory_space<vmem>>, vector<1x128xf32>
    %12 = vector.broadcast %11 : vector<1x128xf32> to vector<8x128xf32>
    %13 = arith.addf %10, %12 : vector<8x128xf32>
    %cst_11 = arith.constant 0.000000e+00 : f32
    %14 = vector.broadcast %cst_11 : f32 to vector<8x128xf32>
    %15 = arith.maximumf %13, %14 : vector<8x128xf32>
    %16 = arith.truncf %15 : vector<8x128xf32> to vector<8x128xbf16>
    %c0_12 = arith.constant 0 : index
    %c0_13 = arith.constant 0 : index
    %17 = vector.load %arg8[%c0_12, %c0_13] : memref<128x64xbf16, #tpu.memory_space<vmem>>, vector<128x64xbf16>
    %cst_14 = arith.constant dense<0.000000e+00> : vector<8x64xf32>
    %18 = tpu.matmul %16, %17, %cst_14 {dimension_numbers = #tpu.dot_dimension_numbers<[1], [0], [0], [1], [0, 0, 1, 1], [], []>} : vector<8x128xbf16>, vector<128x64xbf16>, vector<8x64xf32> -> vector<8x64xf32>
    %c0_15 = arith.constant 0 : index
    %c0_16 = arith.constant 0 : index
    %19 = vector.load %arg9[%c0_15, %c0_16] : memref<1x64xf32, #tpu.memory_space<vmem>>, vector<1x64xf32>
    %20 = vector.broadcast %19 : vector<1x64xf32> to vector<8x64xf32>
    %21 = arith.addf %18, %20 : vector<8x64xf32>
    %cst_17 = arith.constant 0.000000e+00 : f32
    %22 = vector.broadcast %cst_17 : f32 to vector<8x64xf32>
    %23 = arith.maximumf %21, %22 : vector<8x64xf32>
    %24 = arith.truncf %23 : vector<8x64xf32> to vector<8x64xbf16>
    %c0_18 = arith.constant 0 : index
    %c0_19 = arith.constant 0 : index
    %25 = vector.load %arg10[%c0_18, %c0_19] : memref<64x128xbf16, #tpu.memory_space<vmem>>, vector<64x128xbf16>
    %cst_20 = arith.constant dense<0.000000e+00> : vector<8x128xf32>
    %26 = tpu.matmul %24, %25, %cst_20 {dimension_numbers = #tpu.dot_dimension_numbers<[1], [0], [0], [1], [0, 0, 1, 1], [], []>} : vector<8x64xbf16>, vector<64x128xbf16>, vector<8x128xf32> -> vector<8x128xf32>
    %c0_21 = arith.constant 0 : index
    %c0_22 = arith.constant 0 : index
    %27 = vector.load %arg11[%c0_21, %c0_22] : memref<1x128xf32, #tpu.memory_space<vmem>>, vector<1x128xf32>
    %28 = vector.broadcast %27 : vector<1x128xf32> to vector<8x128xf32>
    %29 = arith.addf %26, %28 : vector<8x128xf32>
    %30 = vector.extract_strided_slice %29 {offsets = [0, 0], sizes = [8, 4], strides = [1, 1]} : vector<8x128xf32> to vector<8x4xf32>
    %31 = math.tanh %30 : vector<8x4xf32>
    %32 = vector.extract_strided_slice %29 {offsets = [0, 14], sizes = [8, 1], strides = [1, 1]} : vector<8x128xf32> to vector<8x1xf32>
    %33 = vector.extract_strided_slice %29 {offsets = [0, 15], sizes = [8, 4], strides = [1, 1]} : vector<8x128xf32> to vector<8x4xf32>
    %34 = math.tanh %33 : vector<8x4xf32>
    %cst_23 = arith.constant 2.000000e+00 : f32
    %35 = vector.broadcast %cst_23 : f32 to vector<8x4xf32>
    %36 = arith.mulf %35, %34 : vector<8x4xf32>
    %37 = math.exp %36 : vector<8x4xf32>
    %c0_24 = arith.constant 0 : index
    %c0_25 = arith.constant 0 : index
    %38 = vector.load %arg3[%c0_24, %c0_25] : memref<8x4xf32, #tpu.memory_space<vmem>>, vector<8x4xf32>
    %39 = arith.subf %38, %31 : vector<8x4xf32>
    %40 = arith.mulf %37, %39 : vector<8x4xf32>
    %41 = arith.mulf %40, %39 : vector<8x4xf32>
    %cst_26 = arith.constant dense<0.000000e+00> : vector<8xf32>
    %42 = vector.multi_reduction <add>, %41, %cst_26 [1] : vector<8x4xf32> to vector<8xf32>
    %43 = vector.shape_cast %42 : vector<8xf32> to vector<8x1xf32>
    %cst_27 = arith.constant -5.000000e-01 : f32
    %44 = vector.broadcast %cst_27 : f32 to vector<8x1xf32>
    %45 = arith.mulf %44, %43 : vector<8x1xf32>
    %46 = arith.addf %45, %32 : vector<8x1xf32>
    %c0_28 = arith.constant 0 : index
    %c0_29 = arith.constant 0 : index
    %47 = vector.load %arg2[%c0_28, %c0_29] : memref<8x4xf32, #tpu.memory_space<vmem>>, vector<8x4xf32>
    %cst_30 = arith.constant 0.000000e+00 : f32
    %48 = vector.broadcast %cst_30 : f32 to vector<8x4xf32>
    %49 = arith.subf %48, %34 : vector<8x4xf32>
    %50 = math.exp %49 : vector<8x4xf32>
    %51 = arith.mulf %47, %50 : vector<8x4xf32>
    %52 = arith.addf %31, %51 : vector<8x4xf32>
    %cst_31 = arith.constant -1.000000e+00 : f32
    %cst_32 = arith.constant 1.000000e+00 : f32
    %53 = vector.broadcast %cst_31 : f32 to vector<8x4xf32>
    %54 = arith.maximumf %53, %52 : vector<8x4xf32>
    %55 = vector.broadcast %cst_32 : f32 to vector<8x4xf32>
    %56 = arith.minimumf %55, %54 : vector<8x4xf32>
    %cst_33 = arith.constant 0.000000e+00 : f32
    %57 = vector.broadcast %cst_33 : f32 to vector<8x128xf32>
    %c0_34 = arith.constant 0 : index
    %c0_35 = arith.constant 0 : index
    %58 = vector.load %arg12[%c0_34, %c0_35] : memref<8x128xf32, #tpu.memory_space<vmem>>, vector<8x128xf32>
    tpu.vector_store %arg12[%c0_34, %c0_35], %57 {strides = array<i32>} : memref<8x128xf32, #tpu.memory_space<vmem>>, vector<8x128xf32>,
    %c0_36 = arith.constant 0 : index
    %c0_37 = arith.constant 0 : index
    %59 = vector.load %arg12[%c0_36, %c0_37] : memref<8x128xf32, #tpu.memory_space<vmem>>, vector<8x4xf32>
    tpu.vector_store %arg12[%c0_36, %c0_37], %56 {strides = array<i32>} : memref<8x128xf32, #tpu.memory_space<vmem>>, vector<8x4xf32>,
    %c0_38 = arith.constant 0 : index
    %c4 = arith.constant 4 : index
    %60 = vector.load %arg12[%c0_38, %c4] : memref<8x128xf32, #tpu.memory_space<vmem>>, vector<8x1xf32>
    tpu.vector_store %arg12[%c0_38, %c4], %46 {strides = array<i32>} : memref<8x128xf32, #tpu.memory_space<vmem>>, vector<8x1xf32>,
    %c0_39 = arith.constant 0 : index
    %c5 = arith.constant 5 : index
    %61 = vector.load %arg12[%c0_39, %c5] : memref<8x128xf32, #tpu.memory_space<vmem>>, vector<8x1xf32>
    tpu.vector_store %arg12[%c0_39, %c5], %32 {strides = array<i32>} : memref<8x128xf32, #tpu.memory_space<vmem>>, vector<8x1xf32>,
    return
  }
  func.func @transform_0(%arg0: i32) -> (i32, i32) {
    %c0_i32 = arith.constant 0 : i32
    %c0_i32_0 = arith.constant 0 : i32
    return %arg0, %c0_i32 : i32, i32
  }
  func.func @transform_1(%arg0: i32) -> (i32, i32) {
    %c0_i32 = arith.constant 0 : i32
    %c0_i32_0 = arith.constant 0 : i32
    return %arg0, %c0_i32 : i32, i32
  }
  func.func @transform_2(%arg0: i32) -> (i32, i32) {
    %c0_i32 = arith.constant 0 : i32
    %c0_i32_0 = arith.constant 0 : i32
    return %arg0, %c0_i32 : i32, i32
  }
  func.func @transform_3(%arg0: i32) -> (i32, i32) {
    %c0_i32 = arith.constant 0 : i32
    %c0_i32_0 = arith.constant 0 : i32
    %c0_i32_1 = arith.constant 0 : i32
    return %c0_i32, %c0_i32_0 : i32, i32
  }
  func.func @transform_4(%arg0: i32) -> (i32, i32) {
    %c0_i32 = arith.constant 0 : i32
    %c0_i32_0 = arith.constant 0 : i32
    %c0_i32_1 = arith.constant 0 : i32
    return %c0_i32, %c0_i32_0 : i32, i32
  }
  func.func @transform_5(%arg0: i32) -> (i32, i32) {
    %c0_i32 = arith.constant 0 : i32
    %c0_i32_0 = arith.constant 0 : i32
    %c0_i32_1 = arith.constant 0 : i32
    return %c0_i32, %c0_i32_0 : i32, i32
  }
  func.func @transform_6(%arg0: i32) -> (i32, i32) {
    %c0_i32 = arith.constant 0 : i32
    %c0_i32_0 = arith.constant 0 : i32
    %c0_i32_1 = arith.constant 0 : i32
    return %c0_i32, %c0_i32_0 : i32, i32
  }
  func.func @transform_7(%arg0: i32) -> (i32, i32) {
    %c0_i32 = arith.constant 0 : i32
    %c0_i32_0 = arith.constant 0 : i32
    %c0_i32_1 = arith.constant 0 : i32
    return %c0_i32, %c0_i32_0 : i32, i32
  }
  func.func @transform_8(%arg0: i32) -> (i32, i32) {
    %c0_i32 = arith.constant 0 : i32
    %c0_i32_0 = arith.constant 0 : i32
    %c0_i32_1 = arith.constant 0 : i32
    return %c0_i32, %c0_i32_0 : i32, i32
  }
  func.func @transform_9(%arg0: i32) -> (i32, i32) {
    %c0_i32 = arith.constant 0 : i32
    %c0_i32_0 = arith.constant 0 : i32
    %c0_i32_1 = arith.constant 0 : i32
    return %c0_i32, %c0_i32_0 : i32, i32
  }
  func.func @transform_10(%arg0: i32) -> (i32, i32) {
    %c0_i32 = arith.constant 0 : i32
    %c0_i32_0 = arith.constant 0 : i32
    %c0_i32_1 = arith.constant 0 : i32
    return %c0_i32, %c0_i32_0 : i32, i32
  }
  func.func @transform_11(%arg0: i32) -> (i32, i32) {
    %c0_i32 = arith.constant 0 : i32
    %c0_i32_0 = arith.constant 0 : i32
    return %arg0, %c0_i32 : i32, i32
  }
}

</mosaic_0001>

<bundles_post_ra>
// kernel: tpu_custom_call.1
= control target key start
LH: loop header
LB: loop body
LE: loop exit
PB: predicated region body
PF: predicated region fallthrough
CT: control target
= control target key end

     0   :  { %vm53_vm0 = vcmask 130048   ;;  %s569_s0 = inlined_call_operand.vmem [shape: bf16[8,16], index: 0, kind: input, shape index: {}]   ;;  %s570_s1 = inlined_call_operand.vmem [shape: f32[8,4], index: 1, kind: input, shape index: {}]   ;;  %s571_s2 = inlined_call_operand.vmem [shape: f32[8,4], index: 2, kind: input, shape index: {}]   ;;  %s572_s3 = inlined_call_operand.vmem [shape: bf16[16,32], index: 3, kind: input, shape index: {}]   ;;  %s573_s4 = inlined_call_operand.vmem [shape: f32[1,32], index: 4, kind: input, shape index: {}]   ;;  %s574_s5 = inlined_call_operand.vmem [shape: bf16[32,128], index: 5, kind: input, shape index: {}]   ;;  %s575_s6 = inlined_call_operand.vmem [shape: f32[1,128], index: 6, kind: input, shape index: {}]   ;;  %s576_s7 = inlined_call_operand.vmem [shape: bf16[128,64], index: 7, kind: input, shape index: {}]   ;;  %s577_s8 = inlined_call_operand.vmem [shape: f32[1,64], index: 8, kind: input, shape index: {}]   ;;  %s578_s9 = inlined_call_operand.vmem [shape: bf16[64,128], index: 9, kind: input, shape index: {}]   ;;  %s579_s10 = inlined_call_operand.vmem [shape: f32[1,128], index: 10, kind: input, shape index: {}]   ;;  %s580_s11 = inlined_call_operand.hbm [shape: f32[8,128], index: 11, kind: output, shape index: {}]  }
   0x1   :  { %v375_v0 = vld [vmem:[%s572_s3] sm:$0xff] }
   0x2   :  { %v40_v1 = vld [vmem:[%s569_s0] sm:$0xf]  ;;  %64 = vmatpush.bf16.msra.mxu0 %v375_v0 }
   0x3   :  { %16 = vsyncpa [#allocation3], 0  ;;  %v377_v2 = vld [vmem:[%s574_s5 + $0x8] sm:$0xff]  ;;  %v376_v3 = vld [vmem:[%s574_s5] sm:$0xff]  ;;  %vm92_vm1 = vcmask 261120   ;;  %vm230_vm2 = vcmask 523264  }
   0x4   :  { %102 = vmatpush.bf16.msra.mxu1 %v377_v2  ;;  %v385_v4 = vld [vmem:[%s576_s7 + $0x38] sm:$0xff]  ;;  %v384_v5 = vld [vmem:[%s576_s7 + $0x30] sm:$0xff]  ;;  %v383_v6 = vld [vmem:[%s576_s7 + $0x28] sm:$0xff]  ;;  %vm263_vm3 = vcmask 31744   ;;  %v434_v52 = vmov 0.0   ;;  %s436_s5 = smov 119  }
   0x5   :  { %315 = vmatmul.msk.bf16.vlgmr.msra.gmra.mxu0 %vm53_vm0, %v40_v1  ;;  %179 = vmatpush.bf16.msra.mxu2 %v385_v4  ;;  %v382_v7 = vld [vmem:[%s576_s7 + $0x20] sm:$0xff]  ;;  %v381_v8 = vld [vmem:[%s576_s7 + $0x18] sm:$0xff]  ;;  %v380_v9 = vld [vmem:[%s576_s7 + $0x10] sm:$0xff]  ;;  %281 = vst [vmem:[#allocation2] sm:$0xff] %v434_v52  ;;  %vm287_vm4 = vcmask 39968   ;;  %s437_s14 = smov [#allocation2]  }
   0x6   :  { %v396_v10 = vld [vmem:[%s573_s4] ss:$0 sm:$0xff]  ;;  %v379_v16 = vld [vmem:[%s576_s7 + $0x8] sm:$0xff]  ;;  %v389_v18 = vld [vmem:[%s578_s9 + $0x18] sm:$0xff]  ;;  %s300_s15 = sshll.u32 %s437_s14, 4  ;;  %s302_s18 = sshll.u32 %s580_s11, 4  ;;  %s301_s15 = int_to_ptr.vmem [resolvable:$true] %s300_s15  ;;  %s303_s18 = int_to_ptr.hbm [resolvable:$true] %s302_s18 }
   0x7   :  { %v378_v17 = vld [vmem:[%s576_s7] sm:$0xff]  ;;  %238 = vmatpush.bf16.msra.mxu3 %v389_v18  ;;  %v388_v19 = vld [vmem:[%s578_s9 + $0x10] sm:$0xff]  ;;  %v387_v26 = vld [vmem:[%s578_s9 + $0x8] sm:$0xff]  ;;  %vm293_vm5 = vcmask 48168  }
   0x8   :  { %103 = vmatpush.bf16.msra.mxu1 %v376_v3  ;;  %v397_v20 = vld [vmem:[%s575_s6] ss:$0 sm:$0xff] }
   0x9   :  { %180 = vmatpush.bf16.msra.mxu2 %v384_v5  ;;  %v386_v27 = vld [vmem:[%s578_s9] sm:$0xff] }
   0xa   :  { %v398_v28 = vld [vmem:[%s577_s8] ss:$0 sm:$0xff]  ;;  %s432_s8 = smov 15  }
   0xb   :  { %239 = vmatpush.bf16.msra.mxu3 %v388_v19  ;;  %v399_v34 = vld [vmem:[%s579_s10] ss:$0 sm:$0xff]  ;;  %s433_s10 = smov 113  }
   0xc   :  { %v251_v37 = vld [vmem:[%s571_s2] sm:$0xff]  ;;  %s435_s2 = smov 118  }
   0xd   :  { %181 = vmatpush.bf16.msra.mxu2 %v383_v6  ;;  %v269_v56 = vld [vmem:[%s570_s1] sm:$0xff] }
   0xf   :  { %240 = vmatpush.bf16.msra.mxu3 %v387_v26 }
  0x11   :  { %182 = vmatpush.bf16.msra.mxu2 %v382_v7 }
  0x13   :  { %241 = vmatpush.bf16.msra.mxu3 %v386_v27 }
  0x15   :  { %183 = vmatpush.bf16.msra.mxu2 %v381_v8 }
  0x19   :  { %184 = vmatpush.bf16.msra.mxu2 %v380_v9 }
  0x1d   :  { %185 = vmatpush.bf16.msra.mxu2 %v379_v16 }
  0x21   :  { %186 = vmatpush.bf16.msra.mxu2 %v378_v17 }
  0x82   :  { %v66_v11 = vpop.f32.mrf.mxu0 }
  0x83   :  { %v67_v12 = vadd.f32 %v396_v10, %v66_v11 }
  0x85   :  { %v70_v13 = vmax.f32 %v67_v12, 0.0 }
  0x87   :  { %v71_v14 = vpack.c.bf16 %v70_v13, %v70_v13 }
  0x89   :  { %324 = vmatmul.msk.bf16.vlgmr.msra.gmra.mxu1 %vm92_vm1, %v71_v14 }
  0x8a   :  { %v68_v15 = vpop.f32.mrf.mxu0 }
 0x106   :  { %v105_v21 = vpop.f32.mrf.mxu1 }
 0x107   :  { %v106_v22 = vadd.f32 %v397_v20, %v105_v21 }
 0x109   :  { %v109_v23 = vmax.f32 %v106_v22, 0.0 }
 0x10b   :  { %v110_v24 = vpack.c.bf16 %v109_v23, %v109_v23 }
 0x10d   :  { %187 = vmatmul.bf16.vlgmr.msra.gmra.mxu2 %v110_v24 }
 0x10e   :  { %v107_v25 = vpop.f32.mrf.mxu1 }
 0x190   :  { %v188_v29 = vpop.f32.mrf.mxu2 }
 0x191   :  { %v189_v30 = vadd.f32 %v398_v28, %v188_v29 }
 0x193   :  { %v192_v31 = vmax.f32 %v189_v30, 0.0 }
 0x195   :  { %v193_v32 = vpack.c.bf16 %v192_v31, %v192_v31 }
 0x197   :  { %373 = vmatmul.msk.bf16.vlgmr.msra.gmra.mxu3 %vm230_vm2, %v193_v32 }
 0x198   :  { %v190_v33 = vpop.f32.mrf.mxu2 }
 0x21a   :  { %v243_v35 = vpop.f32.mrf.mxu3 }
 0x21b   :  { %v244_v36 = vadd.f32 %v399_v34, %v243_v35 }
 0x21d   :  { %400 = vtanh.f32 %v244_v36 }
 0x222   :  { %v245_v38 = vpop.f32.mrf.mxu3 }
 0x223   :  { %v401_v39 = vpop.eup %400 }
 0x224   :  { %v252_v40 = vsub.f32 %v251_v37, %v401_v39  ;;  %v248_v41 = vmul.f32 2.0, %v401_v39  ;;  %v270_v49 = vsub.f32 0.0, %v401_v39 }
 0x226   :  { %254 = vrot.lane.b32.xlu0 %v252_v40, %s432_s8  ;;  %v249_v42 = vmul.f32 1.442695, %v248_v41  ;;  %v271_v50 = vmul.f32 1.442695, %v270_v49 }
 0x228   :  { %402 = vpow2.f32 %v249_v42 }
 0x229   :  { %404 = vpow2.f32 %v271_v50 }
 0x22e   :  { %v403_v43 = vpop.eup %402 }
 0x22f   :  { %v405_v51 = vpop.eup %404 }
 0x298   :  { %v255_v44 = vpop.permute.xlu0 %254 }
 0x299   :  { %v257_v45 = vmul.f32 %v403_v43, %v255_v44 }
 0x29b   :  { %v258_v46 = vmul.f32 %v257_v45, %v255_v44 }
 0x29d   :  { %260 = vrot.lane.b32.xlu0 %v258_v46, %s433_s10 }
 0x30f   :  { %v261_v47 = vpop.permute.xlu0 %260 }
 0x310   :  { %v264_v48 = vsel %vm263_vm3, %v261_v47, 0.0 }
 0x311   :  { %265 = vadd.xlane.f32.xlu1 %v264_v48 }
 0x32a   :  { %274 = vrot.lane.b32.xlu1 %v405_v51, %s433_s10 }
 0x384   :  { %v266_v53 = vpop.xlane.xlu1 %265 }
 0x385   :  { %v267_v54 = vmul.f32 -0.5, %v266_v53 }
 0x387   :  { %v268_v55 = vadd.f32 %v267_v54, %v244_v36 }
 0x389   :  { %284 = vrot.lane.b32.xlu2 %v268_v55, %s435_s2 }
 0x391   :  { %290 = vrot.lane.b32.xlu2 %v244_v36, %s436_s5 }
 0x39c   :  { %v275_v57 = vpop.permute.xlu1 %274 }
 0x39d   :  { %v277_v58 = vmul.f32 %v275_v57, %v269_v56 }
 0x39f   :  { %v278_v59 = vadd.f32 %v401_v39, %v277_v58 }
 0x3a1   :  { %v374_v60 = vclamps-f32 %v278_v59, 1.0 }
 0x3a3   :  { %282 = vst.msk [vmem:[#allocation2] sm:$0xff] %vm263_vm3, %v374_v60 }
 0x3e3   :  { %v285_v61 = vpop.permute.xlu2 %284 }
 0x3e4   :  { %288 = vst.msk [vmem:[#allocation2] sm:$0xff] %vm287_vm4, %v285_v61 }
 0x3eb   :  { %v291_v62 = vpop.permute.xlu2 %290 }
 0x3ec   :  { %294 = vst.msk [vmem:[#allocation2] sm:$0xff] %vm293_vm5, %v291_v62 }
 0x3ed   :  { %305 = dma.vmem_to_hbm [thread:$0]  %s301_s15, 128, %s303_s18, [#allocation3]  }
 0x3ee   :  { %430 = dma.done.wait [#allocation3], 128  }
 0x3ef   :  { %431 = vsyncadd [#allocation3], 4294967168 }
 0x3f0   :  { %310 = vsyncpa [#allocation3], 1 }

</bundles_post_ra>
